<compile_context>
chip_gen: v7x
topology: tpu7x:2x2x1
jax: 0.10.0
libtpu: 0.0.40
codegen_flags: <defaults>
</compile_context>

<pallas_src>
import jax
import jax.numpy as jnp
from jax.experimental import pallas as pl
from jax.experimental.pallas import tpu as pltpu


def _rescale_kernel(w_ref, x_ref, o_ref):
    # w_ref: (1, C, 1)   x_ref / o_ref: (1, C, TS)
    # Pure VPU multiply; the size-1 lane dim of w broadcasts across lanes.
    o_ref[...] = (w_ref[...] * x_ref[...]).astype(o_ref.dtype)


def rescale(x: jax.Array, weight: jax.Array) -> jax.Array:
    """Per-channel rescale. x: (N, C, H, W), weight: (C, 1, 1)."""
    n, c, h, w = x.shape
    assert weight.shape == (c, 1, 1)
    hw = h * w
    dsize = jnp.dtype(x.dtype).itemsize

    # Lane-dense views (reshape is free layout plumbing in the wrapper).
    x3 = x.reshape(n, c, hw)
    w3 = weight.astype(x.dtype).reshape(1, c, 1)

    # Spatial tile: largest multiple of 128 such that one (1, C, ts) block is
    # <= ~2 MiB, so 2x(input) + 2x(output) double-buffers (< ~8 MiB total)
    # fit the default scoped VMEM limit on every generation (incl. v7x's
    # 64 MiB physical / 32 MiB scoped VMEM) while still being wide enough to
    # amortize per-grid-step overhead and reach HBM roofline.
    if hw >= 128 and hw % 128 == 0:
        target_block_bytes = 2 * 1024 * 1024
        max_ts = max(128, (target_block_bytes // (c * dsize)) // 128 * 128)
        ts = min(hw, max_ts)
    else:
        # Fall back to the full last dim (allowed when it equals the array dim).
        ts = hw

    grid = (n, pl.cdiv(hw, ts))

    # Advisory cost: 1 flop/element, read + write of x plus the tiny weight.
    cost = pl.CostEstimate(
        flops=n * c * hw,
        transcendentals=0,
        bytes_accessed=2 * n * c * hw * dsize + c * dsize,
    )

    out3 = pl.pallas_call(
        _rescale_kernel,
        out_shape=jax.ShapeDtypeStruct((n, c, hw), x.dtype),
        grid_spec=pltpu.PrefetchScalarGridSpec(
            num_scalar_prefetch=0,
            grid=grid,
            in_specs=[
                # weight: same tiny (1, C, 1) block every grid step
                pl.BlockSpec((1, c, 1), lambda i, s: (0, 0, 0)),
                # x: one (batch, spatial-tile) block per grid step
                pl.BlockSpec((1, c, ts), lambda i, s: (i, 0, s)),
            ],
            out_specs=pl.BlockSpec((1, c, ts), lambda i, s: (i, 0, s)),
        ),
        compiler_params=pltpu.CompilerParams(
            dimension_semantics=("parallel", "parallel"),
        ),
        cost_estimate=cost,
    )(w3, x3)

    return out3.reshape(n, c, h, w)


if __name__ == "__main__":
    key = jax.random.PRNGKey(0)
    kx, kw = jax.random.split(key)

    N, C, H, W = 2, 4, 16, 16
    x = jax.random.normal(kx, (N, C, H, W), dtype=jnp.float32)

    # PyTorch inits weight to ones(C,1,1); perturb deterministically so the
    # test is non-trivial.
    weight = jnp.ones((C, 1, 1), jnp.float32) + 0.1 * jax.random.normal(
        kw, (C, 1, 1), dtype=jnp.float32
    )

    out = rescale(x, weight)
    jax.block_until_ready(out)

    # Reference check (plain JAX broadcasting, identical to PyTorch semantics).
    ref = weight[None, :, :, :] * x
    assert out.shape == x.shape and out.dtype == x.dtype
    assert jnp.allclose(out, ref, atol=1e-6, rtol=1e-6)

    print("KERNEL_OK")
</pallas_src>

<mosaic_0001>
module attributes {stable_mosaic.version = 11 : i64} {
  func.func @_rescale_kernel(%arg0: i32, %arg1: i32, %arg2: memref<1x4x1xf32, #tpu.memory_space<vmem>>, %arg3: memref<1x4x256xf32, #tpu.memory_space<vmem>>, %arg4: memref<1x4x256xf32, #tpu.memory_space<vmem>>) attributes {dimension_semantics = [#tpu.dimension_semantics<parallel>, #tpu.dimension_semantics<parallel>], iteration_bounds = array<i64: 2, 1>, scalar_prefetch = 0 : i64, scratch_operands = 0 : i64, tpu.core_type = #tpu.core_type<tc>, window_params = [{pipeline_mode = #tpu.pipeline_mode<synchronous>, transform_indices = @transform_0, window_bounds = array<i64: 1, 4, 1>}, {transform_indices = @transform_1, window_bounds = array<i64: 1, 4, 256>}, {transform_indices = @transform_2, window_bounds = array<i64: 1, 4, 256>}]} {
    %c0 = arith.constant 0 : index
    %c0_0 = arith.constant 0 : index
    %c0_1 = arith.constant 0 : index
    %0 = vector.load %arg2[%c0, %c0_0, %c0_1] : memref<1x4x1xf32, #tpu.memory_space<vmem>>, vector<1x4x1xf32>
    %c0_2 = arith.constant 0 : index
    %c0_3 = arith.constant 0 : index
    %c0_4 = arith.constant 0 : index
    %1 = vector.load %arg3[%c0_2, %c0_3, %c0_4] : memref<1x4x256xf32, #tpu.memory_space<vmem>>, vector<1x4x256xf32>
    %2 = vector.broadcast %0 : vector<1x4x1xf32> to vector<1x4x256xf32>
    %3 = arith.mulf %2, %1 : vector<1x4x256xf32>
    %c0_5 = arith.constant 0 : index
    %c0_6 = arith.constant 0 : index
    %c0_7 = arith.constant 0 : index
    %4 = vector.load %arg4[%c0_5, %c0_6, %c0_7] : memref<1x4x256xf32, #tpu.memory_space<vmem>>, vector<1x4x256xf32>
    tpu.vector_store %arg4[%c0_5, %c0_6, %c0_7], %3 {strides = array<i32>} : memref<1x4x256xf32, #tpu.memory_space<vmem>>, vector<1x4x256xf32>,
    return
  }
  func.func @transform_0(%arg0: i32, %arg1: i32) -> (i32, i32, i32) {
    %c0_i32 = arith.constant 0 : i32
    %c0_i32_0 = arith.constant 0 : i32
    %c0_i32_1 = arith.constant 0 : i32
    %c0_i32_2 = arith.constant 0 : i32
    return %c0_i32, %c0_i32_0, %c0_i32_1 : i32, i32, i32
  }
  func.func @transform_1(%arg0: i32, %arg1: i32) -> (i32, i32, i32) {
    %c0_i32 = arith.constant 0 : i32
    %c0_i32_0 = arith.constant 0 : i32
    return %arg0, %c0_i32, %arg1 : i32, i32, i32
  }
  func.func @transform_2(%arg0: i32, %arg1: i32) -> (i32, i32, i32) {
    %c0_i32 = arith.constant 0 : i32
    %c0_i32_0 = arith.constant 0 : i32
    return %arg0, %c0_i32, %arg1 : i32, i32, i32
  }
}

</mosaic_0001>

<bundles_post_ra>
// kernel: tpu_custom_call.1
= control target key start
LH: loop header
LB: loop body
LE: loop exit
PB: predicated region body
PF: predicated region fallthrough
CT: control target
= control target key end

     0   :  { %7 = vsyncpa [#allocation3], 0  ;;  %s687_s0 = inlined_call_operand.vmem [shape: f32[1,4,1], index: 0, kind: input, shape index: {}]   ;;  %s688_s1 = inlined_call_operand.hbm [shape: f32[2,4,256], index: 1, kind: input, shape index: {}]   ;;  %s689_s2 = inlined_call_operand.hbm [shape: f32[2,4,256], index: 2, kind: output, shape index: {}]  }
   0x1   :  { %9 = vsyncpa [#allocation3 + $0x1], 0 }
   0x2   :  { %10 = vsyncpa [#allocation4], 0 }
   0x3   :  { %12 = vsyncpa [#allocation4 + $0x1], 0  ;;  %s512_s9 = smov 0   ;;  %s514_s10 = smov 0  }
   0x4   :  { %s516_s11 = smov 0   ;;  %s518_s12 = smov 0  }
   0x5   :  { %s520_s13 = smov 0   ;;  %s522_s14 = smov 0  }
   0x6 LB: > { %s298_s15 = sadd.s32 4294967295, %s492_s14   ;;  %s299_s16 = sadd.s32 4294967294, %s492_s14   ;;  %s492_s14 = sphi %s522_s14, %s18_s14   ;;  %s488_s13 = sphi %s520_s13, %s705_s13   ;;  %s484_s12 = sphi %s518_s12, %s704_s12   ;;  %s480_s11 = sphi %s516_s11, %s703_s11   ;;  %s476_s10 = sphi %s514_s10, %s702_s10   ;;  %s472_s9 = sphi %s512_s9, %s701_s9  }
   0x7   : > { %s30_s17 = sadd.s32 1, %s488_s13  ;;  %s60_s18 = sadd.s32 1, %s480_s11 }
   0x8   : > { %p32_p0 = scmp.ge.s32.totalorder %s30_s17, 2  ;;  %p67_p1 = scmp.ne.s32.totalorder %s480_s11, %s476_s10 }
   0x9   : > { %p68_p2 = scmp.eq.s32.totalorder %s492_s14, 0  ;;  %p73_p3 = scmp.ne.s32.totalorder %s476_s10, %s472_s9 }
   0xa   : > { %s707_s17 = smov (%p32_p0, %s30_s17), 0  ;;  %p74_p5 = scmp.eq.s32.totalorder %s298_s15, 0 }
   0xb   : > { %p553_p4 = por %p68_p2, %p67_p1  ;;  %s55_s20 = ssub.s32 %s488_s13, %s707_s17 }
   0xc   : > { %p99_p6 = scmp.eq.s32.totalorder %s298_s15, 1  ;;  %p58_p7 = scmp.eq.s32.totalorder %s55_s20, 0 }
   0xd   : > { %p559_p8 = por %p74_p5, %p73_p3  ;;  %p105_p10 = scmp.eq.s32.totalorder %s299_s16, 1 }
   0xe   : > { %p563_p9 = por %p99_p6, %p67_p1  ;;  %p327_p13 = scmp.lt.s32.totalorder %s492_s14, 2 }
   0xf   : > { %s568_s23 = scalar_select %p58_p7, %s480_s11, %s60_s18  }
  0x10   : > { %s693_s22 = scalar_select %p563_p9, 1, 0 }
  0x11   : > { %p570_p11 = por %p105_p10, %p73_p3  ;;  %s128_s25 = sand.u32 1, %s480_s11  }
  0x12   : > { %s302_s26 = sshll.u32 %s128_s25, 3  ;;  %s313_s27 = sshll.u32 %s488_s13, 7 }
  0x13   : > { %s694_s24 = scalar_select %p570_p11, 1, 0 }
  0x14   : > { %s581_s30 = scalar_lea.hbm %s688_s1, %s313_s27  ;;  %s132_s3 = scalar_lea.vmem [#allocation2], %s302_s26 }
  0x15   : > { %s142_s4 = sshll.u32 %s132_s3, 4  ;;  %p587_p0 = pnand %p327_p13, %p553_p4  ;;  %s583_s4 = int_to_ptr.vmem [resolvable:$true] %s142_s4 }
  0x16   : > { %s129_s6 = scalar_lea.sflag [#allocation3], %s128_s25  ;;  %s380_s7 = scalar_lea.hbm %s581_s30, 128 }
  0x17   : > { %p381_p3 = scmp.ne.s32.totalorder %s581_s30, %s380_s7  ;;  %p382_p5 = pneg %p587_p0 }
  0x18   : > { %s385_s16 = scalar_lea.hbm %s688_s1, 256  ;;  %p386_p4 = scmp.lt.u32.totalorder %s581_s30, %s688_s1 }
  0x19   : > { %p383_p6 = pnand %p382_p5, %p381_p3  ;;  %p387_p10 = scmp.lt.u32.totalorder %s385_s16, %s380_s7 }
  0x1a   : > { %p389_p12 = scmp.lt.u32.totalorder %s380_s7, %s581_s30 }
  0x1b   : > { %p384_p7 = pneg %p383_p6  ;;  %p388_p13 = por %p387_p10, %p386_p4 }
  0x1d   : > { %p390_p1 = por %p389_p12, %p388_p13 }
  0x1f   : > { %p391_p2 = pnand %p390_p1, %p384_p7 }
  0x21   : > { %394 = shalt.err (!%p391_p2)
}
  0x22   : > { %s395_s20 = scalar_lea.vmem %s583_s4, 128  ;;  %s494_s25 = smov [#allocation2]  }
  0x23   : > { %p396_p3 = scmp.ne.s32.totalorder %s583_s4, %s395_s20  ;;  %s400_s26 = sshll.u32 %s494_s25, 4  ;;  %s401_s26 = int_to_ptr.vmem [resolvable:$false] %s400_s26 }
  0x24   : > { %s402_s27 = scalar_lea.vmem %s401_s26, 256  ;;  %p403_p9 = scmp.lt.s32.totalorder %s583_s4, %s401_s26 }
  0x25   : > { %p398_p6 = pnand %p396_p3, %p382_p5  ;;  %p404_p4 = scmp.lt.s32.totalorder %s402_s27, %s395_s20 }
  0x27   : > { %p399_p11 = pneg %p398_p6  ;;  %p405_p10 = por %p404_p4, %p403_p9 }
  0x29   : > { %p406_p12 = pnand %p405_p10, %p399_p11 }
  0x2b   : > { %409 = shalt.err (!%p406_p12)
}
  0x2c   : > { %322 = dma.hbm_to_vmem [thread:$0]  (!%p587_p0), %s581_s30, 128, %s583_s4, %s129_s6  }
  0x2d   : > { %p696_p1 = scmp.lt.s32.totalorder %s492_s14, 3  ;;  %p697_p2 = scmp.ge.s32.totalorder %s492_s14, 1 }
  0x2f   : > { %p148_p5 = pnand %p697_p2, %p696_p1 }
  0x30   : > { %s623_s28 = sand.u32 (!%p148_p5), 1, %s476_s10  }
  0x31   : > { %151 = sbr.rel (%p148_p5) target bundleno = 205 (0xcd), region = 28  ;;  %s306_s29 = sshll.u32 (!%p148_p5), %s623_s28, 3 }
  0x32   : > { %s154_s3 = scalar_lea.sflag (!%p148_p5), [#allocation3], %s623_s28  ;;  %s157_s7 = scalar_lea.vmem (!%p148_p5), [#allocation2], %s306_s29 }
  0x38   : > { %463 = dma.done.wait (%p559_p8), %s154_s3, 128  }
  0x39   : > { %465 = vsyncadd (%p559_p8), %s154_s3, 4294967168  ;;  %v495_v0 = vmov 0   ;;  %v180_v1 = vld [vmem:[%s687_s0] sm:$0xf]  ;;  %s314_s5 = sshll.u32 %s484_s12, 7  ;;  %s177_s6 = scalar_lea.vmem [#allocation5], %s306_s29 }
  0x3a   : > { %378 = vset.pattern.permute.xlu0 %v495_v0  ;;  %v181_v2 = vld [vmem:[%s157_s7] sm:$0xff]  ;;  %s214_s8 = sshll.u32 %s177_s6, 4  ;;  %s638_s16 = scalar_lea.hbm %s689_s2, %s314_s5  ;;  %s640_s8 = int_to_ptr.vmem [resolvable:$true] %s214_s8 }
  0x3b   : > { %184 = vperm.xlu0 %378, %v180_v1   ;;  %v188_v3 = vcombine.high %v181_v2, %v181_v2  ;;  %s198_s18 = scalar_lea.sflag [#allocation4], %s623_s28  ;;  %s410_s19 = scalar_lea.vmem %s640_s8, 128 }
  0x3c   : > { %p411_p8 = scmp.ne.s32.totalorder %s640_s8, %s410_s19  ;;  %p698_p9 = scmp.ne.s32.totalorder %s693_s22, 0 }
  0x3d   : > { %s496_s12 = smov [#allocation5]  }
  0x3e   : > { %p412_p11 = pnand %p411_p8, %p698_p9  ;;  %s414_s20 = sshll.u32 %s496_s12, 4  ;;  %s415_s20 = int_to_ptr.vmem [resolvable:$false] %s414_s20 }
  0x3f   : > { %s416_s25 = scalar_lea.vmem %s415_s20, 256  ;;  %p417_p7 = scmp.lt.s32.totalorder %s640_s8, %s415_s20 }
  0x40   : > { %p413_p0 = pneg %p412_p11  ;;  %p418_p13 = scmp.lt.s32.totalorder %s416_s25, %s410_s19 }
  0x42   : > { %p419_p3 = por %p418_p13, %p417_p7 }
  0x44   : > { %p420_p6 = pnand %p419_p3, %p413_p0 }
  0xba   : > { %v185_v4 = vpop.permute.xlu0 %184 }
  0xbb   : > { %v190_v5 = vmul.f32 %v185_v4, %v181_v2  ;;  %v191_v6 = vmul.f32 %v188_v3, %v185_v4 }
  0xbd   : > { %v194_v7 = vcombine.low %v190_v5, %v191_v6 }
  0xbf   : > { %196 = vst [vmem:[%s177_s6] sm:$0xff] %v194_v7 }
  0xc0   : > { %423 = shalt.err (!%p420_p6)
}
  0xc1   : > { %s424_s26 = scalar_lea.hbm %s638_s16, 128  ;;  %s428_s29 = scalar_lea.hbm %s689_s2, 256 }
  0xc2   : > { %p425_p4 = scmp.ne.s32.totalorder %s638_s16, %s424_s26  ;;  %p429_p1 = scmp.lt.u32.totalorder %s638_s16, %s689_s2 }
  0xc3   : > { %p430_p2 = scmp.lt.u32.totalorder %s428_s29, %s424_s26  ;;  %p432_p8 = scmp.lt.u32.totalorder %s424_s26, %s638_s16 }
  0xc4   : > { %p426_p10 = pnand %p425_p4, %p698_p9 }
  0xc5   : > { %p431_p5 = por %p430_p2, %p429_p1 }
  0xc6   : > { %p427_p12 = pneg %p426_p10 }
  0xc7   : > { %p433_p11 = por %p432_p8, %p431_p5 }
  0xc9   : > { %p434_p0 = pnand %p433_p11, %p427_p12 }
  0xcb   : > { %437 = shalt.err (!%p434_p0)
}
  0xcc   : > { %317 = dma.vmem_to_hbm [thread:$0]  (%p698_p9), %s640_s8, 128, %s638_s16, %s198_s18  }
  0xcd PF: > { %s226_s30 = sand.u32 1, %s472_s9   ;;  %p699_p7 = scmp.ne.s32.totalorder %s694_s24, 0 }
  0xce   : > { %p700_p13 = scmp.ge.s32.totalorder %s492_s14, 2  ;;  %s227_s4 = scalar_lea.sflag [#allocation4], %s226_s30 }
  0xd0   : > { %p324_p3 = pnand %p700_p13, %p699_p7 }
  0xd2   : > { %467 = dma.done.wait (!%p324_p3), %s227_s4, 128  }
  0xd3   : > { %469 = vsyncadd (!%p324_p3), %s227_s4, 4294967168  ;;  %s18_s14 = sadd.s32 1, %s492_s14   ;;  %s701_s9 = smov %s476_s10 }
  0xd4   : > { %p15_p6 = scmp.ge.s32.totalorder %s18_s14, 4   ;;  %s702_s10 = smov %s480_s11 }
  0xd5   : > { %s703_s11 = smov %s568_s23  ;;  %s704_s12 = smov %s488_s13 }
  0xd6   : > { %s705_s13 = smov %s707_s17  ;;  %17 = sbr.rel (!%p15_p6) target bundleno = 6 (0x6), region = 73 }
  0xdd   :  { %232 = vsyncpa [#allocation3], 1 }
  0xde   :  { %234 = vsyncpa [#allocation3 + $0x1], 1 }
  0xdf   :  { %235 = vsyncpa [#allocation4], 1 }
  0xe0   :  { %237 = vsyncpa [#allocation4 + $0x1], 1 }

</bundles_post_ra>
